<compile_context>
chip_gen: v7x
topology: tpu7x:2x2x1
jax: 0.10.0
libtpu: 0.0.40
codegen_flags: <defaults>
</compile_context>

<pallas_src>
import jax
import jax.numpy as jnp
from jax.experimental import pallas as pl
from jax.experimental.pallas import tpu as pltpu

LANE = 128
SUBLANE = 8
HIDDEN = 256


def _round_up(n, m):
    return ((n + m - 1) // m) * m


def autoencoder_kernel(x_ref,
                       w1_ref, b1_ref,
                       w2_ref, b2_ref,
                       w3_ref, b3_ref,
                       w4_ref, b4_ref,
                       o_ref):
    """Fused 4x (matmul + bias + activation) on one batch tile.

    Matmuls run with bf16 operands and f32 accumulation; bias add, ReLU and
    tanh run in f32.  Weights/biases have constant index_maps so they stay
    resident in VMEM across grid steps.
    """
    cd = w1_ref.dtype                          # MXU compute dtype (bf16)
    x = x_ref[...].astype(cd)                  # f32 -> bf16 cast fused in-kernel

    # encoder
    h1 = jnp.dot(x, w1_ref[...], preferred_element_type=jnp.float32) + b1_ref[...]
    h1 = jnp.maximum(h1, 0.0).astype(cd)                       # ReLU
    z = jnp.dot(h1, w2_ref[...], preferred_element_type=jnp.float32) + b2_ref[...]
    z = jnp.maximum(z, 0.0).astype(cd)                         # ReLU

    # decoder
    h2 = jnp.dot(z, w3_ref[...], preferred_element_type=jnp.float32) + b3_ref[...]
    h2 = jnp.maximum(h2, 0.0).astype(cd)                       # ReLU
    y = jnp.dot(h2, w4_ref[...], preferred_element_type=jnp.float32) + b4_ref[...]
    o_ref[...] = jnp.tanh(y).astype(o_ref.dtype)               # Tanh


def prepare_params(params, compute_dtype=jnp.bfloat16):
    """One-time prep (call once, reuse): cast weights to the MXU compute dtype,
    zero-pad the bottleneck dim (and the feature dim if needed) to 128 lanes."""
    input_dim = params["w1"].shape[0]
    reduced = params["w2"].shape[1]
    d_pad = _round_up(input_dim, LANE)
    r_pad = _round_up(reduced, LANE)

    w1, b1 = params["w1"], params["b1"]
    w2, b2 = params["w2"], params["b2"]
    w3, b3 = params["w3"], params["b3"]
    w4, b4 = params["w4"], params["b4"]

    if d_pad != input_dim:
        # zero weight rows line up with zero-padded x features; zero output
        # cols give tanh(0)=0 and are sliced off after the call.
        w1 = jnp.pad(w1, ((0, d_pad - input_dim), (0, 0)))
        w4 = jnp.pad(w4, ((0, 0), (0, d_pad - input_dim)))
        b4 = jnp.pad(b4, ((0, 0), (0, d_pad - input_dim)))
    if r_pad != reduced:
        # zero columns stay zero through ReLU; zero rows contribute nothing.
        w2 = jnp.pad(w2, ((0, 0), (0, r_pad - reduced)))
        b2 = jnp.pad(b2, ((0, 0), (0, r_pad - reduced)))
        w3 = jnp.pad(w3, ((0, r_pad - reduced), (0, 0)))

    prepared = dict(
        w1=w1.astype(compute_dtype), b1=b1.astype(jnp.float32),
        w2=w2.astype(compute_dtype), b2=b2.astype(jnp.float32),
        w3=w3.astype(compute_dtype), b3=b3.astype(jnp.float32),
        w4=w4.astype(compute_dtype), b4=b4.astype(jnp.float32),
    )
    meta = dict(input_dim=input_dim, d_pad=d_pad, r_pad=r_pad)
    return prepared, meta


def _cap_batch_tile(bt, d_pad, r_pad, weight_bytes, out_itemsize,
                    budget=40 * 1024 * 1024):
    """Shrink batch_tile so double-buffered in/out tiles + resident weights +
    chained-matmul intermediates fit a conservative VMEM budget (safe on v7x's
    64 MiB / smaller scoped VMEM; plenty of headroom on v5e/v6e's 128 MiB)."""
    def footprint(b):
        io = b * d_pad * (4 * 2 + out_itemsize * 2)          # x f32 + out tiles, 2 buffers each
        inter = b * (d_pad * (2 + 4)                          # x bf16 copy + y f32
                     + HIDDEN * 6 * 2                         # h1,h2 in f32 + bf16
                     + r_pad * 6)                             # z in f32 + bf16
        return io + inter + weight_bytes
    while bt > SUBLANE and footprint(bt) > budget:
        bt //= 2
    return max(SUBLANE, (bt // SUBLANE) * SUBLANE)


def autoencoder_forward(x, prepared, meta, *, batch_tile=1024, out_dtype=None,
                        vmem_limit_bytes=48 * 1024 * 1024):
    """x: (B, input_dim) float32.  prepared/meta: output of prepare_params()."""
    B, input_dim = x.shape
    assert input_dim == meta["input_dim"]
    d_pad, r_pad = meta["d_pad"], meta["r_pad"]
    out_dtype = out_dtype or x.dtype          # optionally bf16 to halve writeback traffic

    # Pad the feature axis to 128 lanes only if needed (no-op at input_dim % 128 == 0).
    x_in = x if d_pad == input_dim else jnp.pad(x, ((0, 0), (0, d_pad - input_dim)))

    w1, b1 = prepared["w1"], prepared["b1"]
    w2, b2 = prepared["w2"], prepared["b2"]
    w3, b3 = prepared["w3"], prepared["b3"]
    w4, b4 = prepared["w4"], prepared["b4"]
    weight_bytes = 2 * sum(int(a.size) * a.dtype.itemsize
                           for a in (w1, b1, w2, b2, w3, b3, w4, b4))

    # Tile selection: big lane-dense tiles, capped by VMEM and the batch itself.
    bt = min(batch_tile, _round_up(B, SUBLANE))
    bt = _cap_batch_tile(bt, d_pad, r_pad, weight_bytes,
                         jnp.dtype(out_dtype).itemsize)
    # v7x: guarantee >=2 grid steps so ("parallel",) can use both TensorCores.
    while pl.cdiv(B, bt) < 2 and bt > SUBLANE:
        bt = max(SUBLANE, (bt // 2 // SUBLANE) * SUBLANE)
    n_tiles = pl.cdiv(B, bt)   # ragged tail handled by Pallas partial last block

    def full_spec(shape):
        # whole array resident in VMEM every grid step (constant index_map)
        return pl.BlockSpec(shape, lambda i: (0, 0))

    out = pl.pallas_call(
        autoencoder_kernel,
        out_shape=jax.ShapeDtypeStruct((B, d_pad), out_dtype),
        grid_spec=pltpu.PrefetchScalarGridSpec(
            num_scalar_prefetch=0,
            grid=(n_tiles,),
            in_specs=[
                pl.BlockSpec((bt, d_pad), lambda i: (i, 0)),   # x tile (f32)
                full_spec(w1.shape), full_spec(b1.shape),
                full_spec(w2.shape), full_spec(b2.shape),
                full_spec(w3.shape), full_spec(b3.shape),
                full_spec(w4.shape), full_spec(b4.shape),
            ],
            out_specs=pl.BlockSpec((bt, d_pad), lambda i: (i, 0)),
        ),
        compiler_params=pltpu.CompilerParams(
            dimension_semantics=("parallel",),        # shards tiles across v7x's 2 TCs
            vmem_limit_bytes=vmem_limit_bytes),       # explicit limit: safe on v5e/v6e/v7x
    )(x_in, w1, b1, w2, b2, w3, b3, w4, b4)

    return out if d_pad == input_dim else out[:, :input_dim]


def init_params(key, input_dim, reduced_dim):
    """Deterministic init mimicking nn.Linear (uniform +-1/sqrt(fan_in)).

    Weights are stored as (in, out) = PyTorch W.T so the kernel computes x @ W + b.
    """
    dims = [(input_dim, HIDDEN), (HIDDEN, reduced_dim),
            (reduced_dim, HIDDEN), (HIDDEN, input_dim)]
    params = {}
    for idx, (fan_in, fan_out) in enumerate(dims, start=1):
        key, kw, kb = jax.random.split(key, 3)
        bound = 1.0 / jnp.sqrt(jnp.float32(fan_in))
        params[f"w{idx}"] = jax.random.uniform(
            kw, (fan_in, fan_out), jnp.float32, minval=-bound, maxval=bound)
        params[f"b{idx}"] = jax.random.uniform(
            kb, (1, fan_out), jnp.float32, minval=-bound, maxval=bound)
    return params


def reference_forward(x, p):
    """Pure-JAX f32 reference for correctness check (dropout = identity / eval)."""
    h1 = jnp.maximum(x @ p["w1"] + p["b1"], 0.0)
    z = jnp.maximum(h1 @ p["w2"] + p["b2"], 0.0)
    h2 = jnp.maximum(z @ p["w3"] + p["b3"], 0.0)
    return jnp.tanh(h2 @ p["w4"] + p["b4"])


if __name__ == "__main__":
    key = jax.random.PRNGKey(0)
    input_dim = 128
    reduced_dim = 32

    key, kp, kx1, kx2 = jax.random.split(key, 4)
    params = init_params(kp, input_dim, reduced_dim)
    prepared, meta = prepare_params(params)   # one-time cast/pad (hoisted out of call path)

    # Main check: 2 grid steps (exercises pipelining / the dual-TC parallel path).
    batch = 96
    x1 = jax.random.normal(kx1, (batch, input_dim), jnp.float32)
    out1 = jax.block_until_ready(autoencoder_forward(x1, prepared, meta))
    ref1 = reference_forward(x1, params)
    assert out1.shape == (batch, input_dim)
    # bf16 matmul operands -> loosened tolerance vs f32 reference (K = 128/256).
    assert jnp.allclose(out1, ref1, atol=2e-2, rtol=2e-2), "mismatch vs reference (batch=96)"

    # Ragged-batch check: batch not divisible by batch_tile (partial last block, no pad copy).
    batch2 = 50
    x2 = jax.random.normal(kx2, (batch2, input_dim), jnp.float32)
    out2 = jax.block_until_ready(autoencoder_forward(x2, prepared, meta))
    ref2 = reference_forward(x2, params)
    assert out2.shape == (batch2, input_dim)
    assert jnp.allclose(out2, ref2, atol=2e-2, rtol=2e-2), "mismatch vs reference (batch=50)"

    print("KERNEL_OK")
</pallas_src>

<mosaic_0001>
module attributes {stable_mosaic.version = 11 : i64} {
  func.func @autoencoder_kernel(%arg0: i32, %arg1: memref<48x128xf32, #tpu.memory_space<vmem>>, %arg2: memref<128x256xbf16, #tpu.memory_space<vmem>>, %arg3: memref<1x256xf32, #tpu.memory_space<vmem>>, %arg4: memref<256x128xbf16, #tpu.memory_space<vmem>>, %arg5: memref<1x128xf32, #tpu.memory_space<vmem>>, %arg6: memref<128x256xbf16, #tpu.memory_space<vmem>>, %arg7: memref<1x256xf32, #tpu.memory_space<vmem>>, %arg8: memref<256x128xbf16, #tpu.memory_space<vmem>>, %arg9: memref<1x128xf32, #tpu.memory_space<vmem>>, %arg10: memref<48x128xf32, #tpu.memory_space<vmem>>) attributes {dimension_semantics = [#tpu.dimension_semantics<parallel>], iteration_bounds = array<i64: 2>, scalar_prefetch = 0 : i64, scratch_operands = 0 : i64, tpu.core_type = #tpu.core_type<tc>, window_params = [{transform_indices = @transform_0, window_bounds = array<i64: 48, 128>}, {pipeline_mode = #tpu.pipeline_mode<synchronous>, transform_indices = @transform_1, window_bounds = array<i64: 128, 256>}, {pipeline_mode = #tpu.pipeline_mode<synchronous>, transform_indices = @transform_2, window_bounds = array<i64: 1, 256>}, {pipeline_mode = #tpu.pipeline_mode<synchronous>, transform_indices = @transform_3, window_bounds = array<i64: 256, 128>}, {pipeline_mode = #tpu.pipeline_mode<synchronous>, transform_indices = @transform_4, window_bounds = array<i64: 1, 128>}, {pipeline_mode = #tpu.pipeline_mode<synchronous>, transform_indices = @transform_5, window_bounds = array<i64: 128, 256>}, {pipeline_mode = #tpu.pipeline_mode<synchronous>, transform_indices = @transform_6, window_bounds = array<i64: 1, 256>}, {pipeline_mode = #tpu.pipeline_mode<synchronous>, transform_indices = @transform_7, window_bounds = array<i64: 256, 128>}, {pipeline_mode = #tpu.pipeline_mode<synchronous>, transform_indices = @transform_8, window_bounds = array<i64: 1, 128>}, {transform_indices = @transform_9, window_bounds = array<i64: 48, 128>}]} {
    %c0 = arith.constant 0 : index
    %c0_0 = arith.constant 0 : index
    %0 = vector.load %arg1[%c0, %c0_0] : memref<48x128xf32, #tpu.memory_space<vmem>>, vector<48x128xf32>
    %1 = arith.truncf %0 : vector<48x128xf32> to vector<48x128xbf16>
    %c0_1 = arith.constant 0 : index
    %c0_2 = arith.constant 0 : index
    %2 = vector.load %arg2[%c0_1, %c0_2] : memref<128x256xbf16, #tpu.memory_space<vmem>>, vector<128x256xbf16>
    %cst = arith.constant dense<0.000000e+00> : vector<48x256xf32>
    %3 = tpu.matmul %1, %2, %cst {dimension_numbers = #tpu.dot_dimension_numbers<[1], [0], [0], [1], [0, 0, 1, 1], [], []>} : vector<48x128xbf16>, vector<128x256xbf16>, vector<48x256xf32> -> vector<48x256xf32>
    %c0_3 = arith.constant 0 : index
    %c0_4 = arith.constant 0 : index
    %4 = vector.load %arg3[%c0_3, %c0_4] : memref<1x256xf32, #tpu.memory_space<vmem>>, vector<1x256xf32>
    %5 = vector.broadcast %4 : vector<1x256xf32> to vector<48x256xf32>
    %6 = arith.addf %3, %5 : vector<48x256xf32>
    %cst_5 = arith.constant 0.000000e+00 : f32
    %7 = vector.broadcast %cst_5 : f32 to vector<48x256xf32>
    %8 = arith.maximumf %6, %7 : vector<48x256xf32>
    %9 = arith.truncf %8 : vector<48x256xf32> to vector<48x256xbf16>
    %c0_6 = arith.constant 0 : index
    %c0_7 = arith.constant 0 : index
    %10 = vector.load %arg4[%c0_6, %c0_7] : memref<256x128xbf16, #tpu.memory_space<vmem>>, vector<256x128xbf16>
    %cst_8 = arith.constant dense<0.000000e+00> : vector<48x128xf32>
    %11 = tpu.matmul %9, %10, %cst_8 {dimension_numbers = #tpu.dot_dimension_numbers<[1], [0], [0], [1], [0, 0, 1, 1], [], []>} : vector<48x256xbf16>, vector<256x128xbf16>, vector<48x128xf32> -> vector<48x128xf32>
    %c0_9 = arith.constant 0 : index
    %c0_10 = arith.constant 0 : index
    %12 = vector.load %arg5[%c0_9, %c0_10] : memref<1x128xf32, #tpu.memory_space<vmem>>, vector<1x128xf32>
    %13 = vector.broadcast %12 : vector<1x128xf32> to vector<48x128xf32>
    %14 = arith.addf %11, %13 : vector<48x128xf32>
    %cst_11 = arith.constant 0.000000e+00 : f32
    %15 = vector.broadcast %cst_11 : f32 to vector<48x128xf32>
    %16 = arith.maximumf %14, %15 : vector<48x128xf32>
    %17 = arith.truncf %16 : vector<48x128xf32> to vector<48x128xbf16>
    %c0_12 = arith.constant 0 : index
    %c0_13 = arith.constant 0 : index
    %18 = vector.load %arg6[%c0_12, %c0_13] : memref<128x256xbf16, #tpu.memory_space<vmem>>, vector<128x256xbf16>
    %cst_14 = arith.constant dense<0.000000e+00> : vector<48x256xf32>
    %19 = tpu.matmul %17, %18, %cst_14 {dimension_numbers = #tpu.dot_dimension_numbers<[1], [0], [0], [1], [0, 0, 1, 1], [], []>} : vector<48x128xbf16>, vector<128x256xbf16>, vector<48x256xf32> -> vector<48x256xf32>
    %c0_15 = arith.constant 0 : index
    %c0_16 = arith.constant 0 : index
    %20 = vector.load %arg7[%c0_15, %c0_16] : memref<1x256xf32, #tpu.memory_space<vmem>>, vector<1x256xf32>
    %21 = vector.broadcast %20 : vector<1x256xf32> to vector<48x256xf32>
    %22 = arith.addf %19, %21 : vector<48x256xf32>
    %cst_17 = arith.constant 0.000000e+00 : f32
    %23 = vector.broadcast %cst_17 : f32 to vector<48x256xf32>
    %24 = arith.maximumf %22, %23 : vector<48x256xf32>
    %25 = arith.truncf %24 : vector<48x256xf32> to vector<48x256xbf16>
    %c0_18 = arith.constant 0 : index
    %c0_19 = arith.constant 0 : index
    %26 = vector.load %arg8[%c0_18, %c0_19] : memref<256x128xbf16, #tpu.memory_space<vmem>>, vector<256x128xbf16>
    %cst_20 = arith.constant dense<0.000000e+00> : vector<48x128xf32>
    %27 = tpu.matmul %25, %26, %cst_20 {dimension_numbers = #tpu.dot_dimension_numbers<[1], [0], [0], [1], [0, 0, 1, 1], [], []>} : vector<48x256xbf16>, vector<256x128xbf16>, vector<48x128xf32> -> vector<48x128xf32>
    %c0_21 = arith.constant 0 : index
    %c0_22 = arith.constant 0 : index
    %28 = vector.load %arg9[%c0_21, %c0_22] : memref<1x128xf32, #tpu.memory_space<vmem>>, vector<1x128xf32>
    %29 = vector.broadcast %28 : vector<1x128xf32> to vector<48x128xf32>
    %30 = arith.addf %27, %29 : vector<48x128xf32>
    %31 = math.tanh %30 : vector<48x128xf32>
    %c0_23 = arith.constant 0 : index
    %c0_24 = arith.constant 0 : index
    %32 = vector.load %arg10[%c0_23, %c0_24] : memref<48x128xf32, #tpu.memory_space<vmem>>, vector<48x128xf32>
    tpu.vector_store %arg10[%c0_23, %c0_24], %31 {strides = array<i32>} : memref<48x128xf32, #tpu.memory_space<vmem>>, vector<48x128xf32>,
    return
  }
  func.func @transform_0(%arg0: i32) -> (i32, i32) {
    %c0_i32 = arith.constant 0 : i32
    %c0_i32_0 = arith.constant 0 : i32
    return %arg0, %c0_i32 : i32, i32
  }
  func.func @transform_1(%arg0: i32) -> (i32, i32) {
    %c0_i32 = arith.constant 0 : i32
    %c0_i32_0 = arith.constant 0 : i32
    %c0_i32_1 = arith.constant 0 : i32
    return %c0_i32, %c0_i32_0 : i32, i32
  }
  func.func @transform_2(%arg0: i32) -> (i32, i32) {
    %c0_i32 = arith.constant 0 : i32
    %c0_i32_0 = arith.constant 0 : i32
    %c0_i32_1 = arith.constant 0 : i32
    return %c0_i32, %c0_i32_0 : i32, i32
  }
  func.func @transform_3(%arg0: i32) -> (i32, i32) {
    %c0_i32 = arith.constant 0 : i32
    %c0_i32_0 = arith.constant 0 : i32
    %c0_i32_1 = arith.constant 0 : i32
    return %c0_i32, %c0_i32_0 : i32, i32
  }
  func.func @transform_4(%arg0: i32) -> (i32, i32) {
    %c0_i32 = arith.constant 0 : i32
    %c0_i32_0 = arith.constant 0 : i32
    %c0_i32_1 = arith.constant 0 : i32
    return %c0_i32, %c0_i32_0 : i32, i32
  }
  func.func @transform_5(%arg0: i32) -> (i32, i32) {
    %c0_i32 = arith.constant 0 : i32
    %c0_i32_0 = arith.constant 0 : i32
    %c0_i32_1 = arith.constant 0 : i32
    return %c0_i32, %c0_i32_0 : i32, i32
  }
  func.func @transform_6(%arg0: i32) -> (i32, i32) {
    %c0_i32 = arith.constant 0 : i32
    %c0_i32_0 = arith.constant 0 : i32
    %c0_i32_1 = arith.constant 0 : i32
    return %c0_i32, %c0_i32_0 : i32, i32
  }
  func.func @transform_7(%arg0: i32) -> (i32, i32) {
    %c0_i32 = arith.constant 0 : i32
    %c0_i32_0 = arith.constant 0 : i32
    %c0_i32_1 = arith.constant 0 : i32
    return %c0_i32, %c0_i32_0 : i32, i32
  }
  func.func @transform_8(%arg0: i32) -> (i32, i32) {
    %c0_i32 = arith.constant 0 : i32
    %c0_i32_0 = arith.constant 0 : i32
    %c0_i32_1 = arith.constant 0 : i32
    return %c0_i32, %c0_i32_0 : i32, i32
  }
  func.func @transform_9(%arg0: i32) -> (i32, i32) {
    %c0_i32 = arith.constant 0 : i32
    %c0_i32_0 = arith.constant 0 : i32
    return %arg0, %c0_i32 : i32, i32
  }
}

</mosaic_0001>

<bundles_post_ra>
// kernel: tpu_custom_call.1
= control target key start
LH: loop header
LB: loop body
LE: loop exit
PB: predicated region body
PF: predicated region fallthrough
CT: control target
= control target key end

     0   :  { %s2278_s0 = inlined_call_operand.hbm [shape: f32[96,128], index: 0, kind: input, shape index: {}]   ;;  %s2279_s1 = inlined_call_operand.hbm [shape: bf16[128,256], index: 1, kind: input, shape index: {}]   ;;  %s2280_s2 = inlined_call_operand.vmem [shape: f32[1,256], index: 2, kind: input, shape index: {}]   ;;  %s2281_s3 = inlined_call_operand.hbm [shape: bf16[256,128], index: 3, kind: input, shape index: {}]   ;;  %s2282_s4 = inlined_call_operand.vmem [shape: f32[1,128], index: 4, kind: input, shape index: {}]   ;;  %s2283_s5 = inlined_call_operand.hbm [shape: bf16[128,256], index: 5, kind: input, shape index: {}]   ;;  %s2284_s6 = inlined_call_operand.vmem [shape: f32[1,256], index: 6, kind: input, shape index: {}]   ;;  %s2285_s7 = inlined_call_operand.hbm [shape: bf16[256,128], index: 7, kind: input, shape index: {}]   ;;  %s2286_s8 = inlined_call_operand.vmem [shape: f32[1,128], index: 8, kind: input, shape index: {}]   ;;  %s2287_s9 = inlined_call_operand.hbm [shape: f32[96,128], index: 9, kind: output, shape index: {}]  }
   0x1   :  { %2296 = sst [smem:[#allocation18_spill]] %s2287_s9 }
   0x2   :  { %14 = vsyncpa [#allocation3], 0 }
   0x3   :  { %16 = vsyncpa [#allocation3 + $0x1], 0 }
   0x4   :  { %17 = vsyncpa [#allocation6], 0 }
   0x5   :  { %18 = vsyncpa [#allocation9], 0 }
   0x6   :  { %19 = vsyncpa [#allocation4], 0 }
   0x7   :  { %21 = vsyncpa [#allocation4 + $0x1], 0  ;;  %s1950_s30 = smov 0   ;;  %s1952_s10 = smov 0  }
   0x8   :  { %s1954_s11 = smov 0   ;;  %s1956_s12 = smov 0  }
   0x9 LB: > { %2297 = sst [smem:[#allocation16_spill]] %s1873_s30  ;;  %s1971_s13 = sadd.s32 4294967295, %s1885_s12   ;;  %s1885_s12 = sphi %s1956_s12, %s2323_s12   ;;  %s1881_s11 = sphi %s1954_s11, %s2322_s11   ;;  %s1877_s10 = sphi %s1952_s10, %s2321_s10   ;;  %s1873_s30 = sphi %s1950_s30, %s2320_s30  }
   0xa   : > { %s1329_s14 = sadd.s32 4294967294, %s1885_s12   ;;  %p47_p0 = scmp.ne.s32.totalorder %s1877_s10, %s1873_s30 }
   0xb   : > { %p2288_p1 = scmp.eq.s32.totalorder %s1971_s13, 0  ;;  %p245_p3 = scmp.eq.s32.totalorder %s1329_s14, 1 }
   0xc   : > { %p1330_p5 = scmp.ge.s32.totalorder %s1885_s12, 1  ;;  %p252_p7 = scmp.lt.s32.totalorder %s1885_s12, 3 }
   0xd   : > { %p1980_p4 = por %p2288_p1, %p47_p0  ;;  %p1985_p6 = por %p245_p3, %p47_p0 }
   0xe   : > { %p1990_p8 = pnand %p1330_p5, %p252_p7  ;;  %s1887_s18 = smov [#allocation5]  }
   0xf   : > { %s2298_s15 = scalar_select %p1980_p4, 1, 0 }
  0x10   : > { %s2299_s16 = scalar_select %p1985_p6, 1, 0 }
  0x11   : > { %s2301_s17 = scalar_select %p1990_p8, 1, 0 }
  0x12   : > { %2300 = sst [smem:[#allocation17_spill]] %s2299_s16  ;;  %s264_s19 = sshll.u32 %s1887_s18, 4  ;;  %s1994_s19 = int_to_ptr.vmem [resolvable:$true] %s264_s19 }
  0x13   : > { %p1503_p9 = pneg %p1990_p8  ;;  %s1888_s21 = smov [#allocation8]  }
  0x14   : > { %s296_s22 = sshll.u32 %s1888_s21, 4  ;;  %s1889_s23 = smov [#allocation7]   ;;  %s2005_s22 = int_to_ptr.vmem [resolvable:$true] %s296_s22 }
  0x15   : > { %p2001_p11 = pnand %p1503_p9, %p2288_p1  ;;  %s2007_s24 = sshll.u32 %s1889_s23, 4  ;;  %s281_s24 = int_to_ptr.vmem [resolvable:$true] %s2007_s24 }
  0x16   : > { %s1669_s27 = scalar_lea.hbm %s2279_s1, 2048 }
  0x17   : > { %p1670_p12 = scmp.ne.s32.totalorder %s2279_s1, %s1669_s27  ;;  %p2017_p13 = pneg %p2001_p11 }
  0x18   : > { %p1676_p5 = scmp.lt.u32.totalorder %s1669_s27, %s2279_s1 }
  0x19   : > { %p1672_p0 = pnand %p2017_p13, %p1670_p12 }
  0x1b   : > { %p1673_p3 = pneg %p1672_p0 }
  0x1d   : > { %p1678_p7 = pnand %p1676_p5, %p1673_p3 }
  0x1f   : > { %1681 = shalt.err (!%p1678_p7)
}
  0x20   : > { %s1682_s23 = scalar_lea.vmem %s1994_s19, 2048  ;;  %p1690_p2 = scmp.lt.s32.totalorder %s1994_s19, %s1994_s19 }
  0x21   : > { %p1683_p9 = scmp.ne.s32.totalorder %s1994_s19, %s1682_s23  ;;  %p1691_p6 = scmp.lt.s32.totalorder %s1682_s23, %s1682_s23 }
  0x23   : > { %p1685_p10 = pnand %p1683_p9, %p2017_p13  ;;  %p1692_p12 = por %p1691_p6, %p1690_p2 }
  0x25   : > { %p1686_p1 = pneg %p1685_p10 }
  0x27   : > { %p1693_p0 = pnand %p1692_p12, %p1686_p1 }
  0x29   : > { %1696 = shalt.err (!%p1693_p0)
}
  0x2a   : > { %s2294_s25 = smov 128   ;;  %s2295_s26 = smov 8  }
  0x2b   : > { %1506 = dma.hbm_to_vmem [thread:$0]  (!%p2001_p11), %s2279_s1, 2048, %s1994_s19, [#allocation6], %s2294_s25, %s2294_s25, %s2295_s26  }
  0x2c   : > { %s1697_s21 = scalar_lea.hbm %s2283_s5, 2048 }
  0x2d   : > { %p1698_p1 = scmp.ne.s32.totalorder %s2283_s5, %s1697_s21  ;;  %p1704_p10 = scmp.lt.u32.totalorder %s1697_s21, %s2283_s5 }
  0x2f   : > { %p1700_p2 = pnand %p1698_p1, %p2017_p13 }
  0x31   : > { %p1701_p6 = pneg %p1700_p2 }
  0x33   : > { %p1706_p3 = pnand %p1704_p10, %p1701_p6 }
  0x35   : > { %1709 = shalt.err (!%p1706_p3)
}
  0x36   : > { %s1710_s19 = scalar_lea.vmem %s2005_s22, 2048  ;;  %p1718_p12 = scmp.lt.s32.totalorder %s2005_s22, %s2005_s22 }
  0x37   : > { %p1711_p5 = scmp.ne.s32.totalorder %s2005_s22, %s1710_s19  ;;  %p1719_p0 = scmp.lt.s32.totalorder %s1710_s19, %s1710_s19 }
  0x39   : > { %p1713_p7 = pnand %p1711_p5, %p2017_p13  ;;  %p1720_p1 = por %p1719_p0, %p1718_p12 }
  0x3b   : > { %p1714_p9 = pneg %p1713_p7 }
  0x3d   : > { %p1721_p2 = pnand %p1720_p1, %p1714_p9 }
  0x3f   : > { %1724 = shalt.err (!%p1721_p2)
}
  0x40   : > { %1512 = dma.hbm_to_vmem [thread:$0]  (!%p2001_p11), %s2283_s5, 2048, %s2005_s22, [#allocation9], %s2294_s25, %s2294_s25, %s2295_s26  }
  0x41   : > { %s1725_s28 = scalar_lea.hbm %s2281_s3, 2048 }
  0x42   : > { %p1726_p6 = scmp.ne.s32.totalorder %s2281_s3, %s1725_s28  ;;  %p1732_p5 = scmp.lt.u32.totalorder %s1725_s28, %s2281_s3 }
  0x44   : > { %p1728_p10 = pnand %p1726_p6, %p2017_p13 }
  0x46   : > { %p1729_p3 = pneg %p1728_p10 }
  0x48   : > { %p1734_p7 = pnand %p1732_p5, %p1729_p3 }
  0x4a   : > { %1737 = shalt.err (!%p1734_p7)
}
  0x4b   : > { %s1738_s19 = scalar_lea.vmem %s281_s24, 2048  ;;  %p1746_p1 = scmp.lt.s32.totalorder %s281_s24, %s281_s24 }
  0x4c   : > { %p1739_p9 = scmp.ne.s32.totalorder %s281_s24, %s1738_s19  ;;  %p1747_p2 = scmp.lt.s32.totalorder %s1738_s19, %s1738_s19 }
  0x4e   : > { %p1741_p12 = pnand %p1739_p9, %p2017_p13  ;;  %p1748_p4 = por %p1747_p2, %p1746_p1 }
  0x50   : > { %p1742_p0 = pneg %p1741_p12 }
  0x52   : > { %p1749_p8 = pnand %p1748_p4, %p1742_p0 }
  0x54   : > { %1752 = shalt.err (!%p1749_p8)
}
  0x55   : > { %s1892_s22 = smov 64   ;;  %s1893_s9 = smov 4  }
  0x56   : > { %1509 = dma.hbm_to_vmem [thread:$0]  (!%p2001_p11), %s2281_s3, 2048, %s281_s24, [#allocation6], %s1892_s22, %s1892_s22, %s1893_s9  }
  0x57   : > { %s1894_s27 = smov [#allocation10]   ;;  %s1753_s21 = scalar_lea.hbm %s2285_s7, 2048 }
  0x58   : > { %s312_s28 = sshll.u32 %s1894_s27, 4  ;;  %p1754_p4 = scmp.ne.s32.totalorder %s2285_s7, %s1753_s21  ;;  %s313_s28 = int_to_ptr.vmem [resolvable:$true] %s312_s28 }
  0x59   : > { %p1760_p10 = scmp.lt.u32.totalorder %s1753_s21, %s2285_s7 }
  0x5a   : > { %p1756_p8 = pnand %p1754_p4, %p2017_p13 }
  0x5c   : > { %p1757_p6 = pneg %p1756_p8 }
  0x5e   : > { %p1762_p3 = pnand %p1760_p10, %p1757_p6 }
  0x60   : > { %1765 = shalt.err (!%p1762_p3)
}
  0x61   : > { %s1766_s24 = scalar_lea.vmem %s313_s28, 2048  ;;  %p1774_p12 = scmp.lt.s32.totalorder %s313_s28, %s313_s28 }
  0x62   : > { %p1767_p5 = scmp.ne.s32.totalorder %s313_s28, %s1766_s24  ;;  %p1775_p0 = scmp.lt.s32.totalorder %s1766_s24, %s1766_s24 }
  0x64   : > { %p1769_p7 = pnand %p1767_p5, %p2017_p13  ;;  %p1776_p1 = por %p1775_p0, %p1774_p12 }
  0x66   : > { %p1770_p9 = pneg %p1769_p7 }
  0x68   : > { %p1777_p2 = pnand %p1776_p1, %p1770_p9 }
  0x6a   : > { %1780 = shalt.err (!%p1777_p2)
}
  0x6b   : > { %1515 = dma.hbm_to_vmem [thread:$0]  (!%p2001_p11), %s2285_s7, 2048, %s313_s28, [#allocation9], %s1892_s22, %s1892_s22, %s1893_s9  }
  0x6c   : > { %s2105_s14 = sadd.s32 1, %s1885_s12   ;;  %s34_s25 = sadd.s32 1, %s1881_s11 }
  0x6d   : > { %s31_s20 = ssub.s32 %s1885_s12, %s2105_s14  ;;  %p41_p13 = scmp.ne.s32.totalorder %s1881_s11, %s1877_s10 }
  0x6e   : > { %p32_p4 = scmp.eq.s32.totalorder %s31_s20, 0  ;;  %p42_p8 = scmp.eq.s32.totalorder %s1885_s12, 0 }
  0x6f   : > { %p2304_p6 = scmp.eq.s32.totalorder %s1971_s13, 1  ;;  %p1528_p3 = scmp.lt.s32.totalorder %s1885_s12, 2 }
  0x70   : > { %s2121_s27 = scalar_select %p32_p4, %s1881_s11, %s34_s25  }
  0x71   : > { %p2115_p10 = por %p2304_p6, %p41_p13  ;;  %p43_p5 = por %p42_p8, %p41_p13 }
  0x72   : > { %s329_s29 = sand.u32 1, %s1881_s11   ;;  %s1411_s22 = smul.u32 768, %s1885_s12 }
  0x73   : > { %s1481_s18 = smul.u32 48, %s329_s29  ;;  %p2125_p11 = pnand %p1528_p3, %p43_p5 }
  0x74   : > { %s2132_s23 = scalar_lea.hbm %s2278_s0, %s1411_s22  ;;  %s2136_s30 = scalar_lea.sflag [#allocation3], %s329_s29 }
  0x75   : > { %s333_s19 = scalar_lea.vmem [#allocation2], %s1481_s18  ;;  %s1781_s16 = scalar_lea.hbm %s2132_s23, 768 }
  0x76   : > { %s340_s24 = sshll.u32 %s333_s19, 4  ;;  %p1782_p7 = scmp.ne.s32.totalorder %s2132_s23, %s1781_s16  ;;  %s2134_s24 = int_to_ptr.vmem [resolvable:$true] %s340_s24 }
  0x77   : > { %p1783_p9 = pneg %p2125_p11  ;;  %s1786_s22 = scalar_lea.hbm %s2278_s0, 1536 }
  0x78   : > { %p1787_p1 = scmp.lt.u32.totalorder %s2132_s23, %s2278_s0  ;;  %p1788_p2 = scmp.lt.u32.totalorder %s1786_s22, %s1781_s16 }
  0x79   : > { %p1784_p12 = pnand %p1783_p9, %p1782_p7  ;;  %p1790_p4 = scmp.lt.u32.totalorder %s1781_s16, %s2132_s23 }
  0x7a   : > { %p1789_p13 = por %p1788_p2, %p1787_p1 }
  0x7b   : > { %p1785_p0 = pneg %p1784_p12 }
  0x7c   : > { %p1791_p8 = por %p1790_p4, %p1789_p13 }
  0x7e   : > { %p1792_p6 = pnand %p1791_p8, %p1785_p0 }
  0x80   : > { %1795 = shalt.err (!%p1792_p6)
}
  0x81   : > { %s1796_s29 = scalar_lea.vmem %s2134_s24, 768  ;;  %s1895_s18 = smov [#allocation2]  }
  0x82   : > { %p1797_p3 = scmp.ne.s32.totalorder %s2134_s24, %s1796_s29  ;;  %s1801_s19 = sshll.u32 %s1895_s18, 4  ;;  %s1802_s19 = int_to_ptr.vmem [resolvable:$false] %s1801_s19 }
  0x83   : > { %s1803_s25 = scalar_lea.vmem %s1802_s19, 1536  ;;  %p1804_p12 = scmp.lt.s32.totalorder %s2134_s24, %s1802_s19 }
  0x84   : > { %p1799_p5 = pnand %p1797_p3, %p1783_p9  ;;  %p1805_p1 = scmp.lt.s32.totalorder %s1803_s25, %s1796_s29 }
  0x86   : > { %p1800_p7 = pneg %p1799_p5  ;;  %p1806_p2 = por %p1805_p1, %p1804_p12 }
  0x88   : > { %p1807_p13 = pnand %p1806_p2, %p1800_p7 }
  0x8a   : > { %1810 = shalt.err (!%p1807_p13)
}
  0x8b   : > { %s2307_s16 = smov 8   ;;  %s2308_s20 = smov 128  }
  0x8c   : > { %1519 = dma.hbm_to_vmem [thread:$0]  (!%p2125_p11), %s2132_s23, 768, %s2134_s24, %s2136_s30, %s2308_s20, %s2308_s20, %s2307_s16  }
  0x8d   : > { %p2309_p9 = scmp.ne.s32.totalorder %s2301_s17, 0 }
  0x8e   : > { %s2170_s22 = sand.u32 (!%p2309_p9), 1, %s1877_s10   ;;  %p2310_p0 = scmp.ne.s32.totalorder (!%p2309_p9), %s2298_s15, 0 }
  0x8f   : > { %352 = sbr.rel (%p2309_p9) target bundleno = 1119 (0x45f), region = 56  ;;  %s355_s21 = scalar_lea.sflag (!%p2309_p9), [#allocation3], %s2170_s22 }
  0x90   : > { %s1482_s28 = smul.u32 (!%p2309_p9), 48, %s2170_s22 }
  0x92   : > { %s2176_s9 = scalar_lea.vmem (!%p2309_p9), [#allocation2], %s1482_s28 }
  0x96   : > { %1856 = dma.done.wait (%p2310_p0), %s355_s21, 768  }
  0x97   : > { %1858 = vsyncadd (%p2310_p0), %s355_s21, 4294966528  ;;  %p2311_p11 = scmp.eq.s32.totalorder %s1971_s13, 0 }
  0x99   : > { %1860 = dma.done.wait (%p2311_p11), [#allocation6], 4096   ;;  %p2312_p4 = pmov %p2311_p11 }
  0x9b   : > { %1862 = vsyncadd (%p2312_p4), [#allocation6], 4294963200  ;;  %p2313_p8 = pmov %p2312_p4 }
  0x9c   : > { %p2314_p6 = pmov %p2312_p4 }
  0x9d   : > { %1864 = dma.done.wait (%p2313_p8), [#allocation9], 4096  }
  0x9e   : > { %1866 = vsyncadd (%p2314_p6), [#allocation9], 4294963200  ;;  %v1896_v0 = vmov 0   ;;  %v1577_v1 = vld [vmem:[#allocation5 + $0x4] ss:$8 sps:$4 sm:$0xff]   ;;  %v1605_v16 = vld [vmem:[#allocation7 + $0x50] sm:$0xff]   ;;  %v439_v52 = vlaneseq }
  0x9f   : > { %561 = vmatprep.mubr.bf16.mxu0 %v1896_v0  ;;  %v1579_v2 = vld [vmem:[#allocation5] ss:$8 sps:$4 sm:$0xff]   ;;  %529 = vmatprep.subr.bf16.mxu0 %v1577_v1  ;;  %v1580_v3 = vld [vmem:[#allocation5 + $0x14] ss:$8 sps:$4 sm:$0xff]   ;;  %v1582_v4 = vld [vmem:[#allocation5 + $0x10] ss:$8 sps:$4 sm:$0xff]  }
  0xa0   : > { %530 = vmatpush1.bf16.msra.mxu0 %v1579_v2  ;;  %v1583_v5 = vld [vmem:[#allocation5 + $0x24] ss:$8 sps:$4 sm:$0xff]   ;;  %v1585_v6 = vld [vmem:[#allocation5 + $0x20] ss:$8 sps:$4 sm:$0xff]   ;;  %v1586_v7 = vld [vmem:[#allocation5 + $0x34] ss:$8 sps:$4 sm:$0xff]  }
  0xa1   : > { %531 = vmatprep.subr.bf16.mxu0 %v1580_v3  ;;  %v1588_v8 = vld [vmem:[#allocation5 + $0x30] ss:$8 sps:$4 sm:$0xff]   ;;  %v1589_v9 = vld [vmem:[#allocation5 + $0x44] ss:$8 sps:$4 sm:$0xff]   ;;  %v1591_v10 = vld [vmem:[#allocation5 + $0x40] ss:$8 sps:$4 sm:$0xff]  }
  0xa2   : > { %v1601_v11 = vld [vmem:[#allocation7 + $0x40] sm:$0xff]   ;;  %v1592_v12 = vld [vmem:[#allocation5 + $0x54] ss:$8 sps:$4 sm:$0xff]   ;;  %v1603_v14 = vld [vmem:[#allocation7 + $0x48] sm:$0xff]   ;;  %v2200_v53 = vshrl.u32 %v439_v52, 7  ;;  %s408_s25 = scalar_lea.vmem [#allocation11], %s1482_s28 }
  0xa3   : > { %v1602_v13 = vld [vmem:[#allocation7] sm:$0xff]   ;;  %1413 = vmatprep.subr.bf16.mxu1 %v1601_v11  ;;  %v1604_v15 = vld [vmem:[#allocation7 + $0x8] sm:$0xff]   ;;  %v1594_v17 = vld [vmem:[#allocation5 + $0x50] ss:$8 sps:$4 sm:$0xff]   ;;  %s1412_s16 = smul.u32 768, %s1971_s13  ;;  %s1218_s20 = sshll.u32 %s408_s25, 4  ;;  %s2234_s20 = int_to_ptr.vmem [resolvable:$true] %s1218_s20 }
  0xa4   : > { %532 = vmatpush1.bf16.msra.mxu0 %v1582_v4  ;;  %1414 = vmatpush3.bf16.msra.mxu1 %v1602_v13  ;;  %v1595_v18 = vld [vmem:[#allocation5 + $0x64] ss:$8 sps:$4 sm:$0xff]   ;;  %v1606_v19 = vld [vmem:[#allocation7 + $0x10] sm:$0xff]   ;;  %v1597_v20 = vld [vmem:[#allocation5 + $0x60] ss:$8 sps:$4 sm:$0xff]   ;;  %v441_v54 = vsub.s32 0, %v2200_v53 }
  0xa5   : > { %533 = vmatprep.subr.bf16.mxu0 %v1583_v5  ;;  %1415 = vmatprep.subr.bf16.mxu1 %v1603_v14  ;;  %v1607_v21 = vld [vmem:[#allocation7 + $0x58] sm:$0xff]   ;;  %v1609_v24 = vld [vmem:[#allocation7 + $0x60] sm:$0xff]   ;;  %v1611_v29 = vld [vmem:[#allocation7 + $0x68] sm:$0xff]   ;;  %v445_v56 = vsub.s32 1, %v2200_v53  ;;  %s1205_s17 = scalar_lea.sflag [#allocation4], %s2170_s22  ;;  %s1811_s23 = scalar_lea.vmem %s2234_s20, 768 }
  0xa6   : > { %v1598_v22 = vld [vmem:[#allocation5 + $0x74] ss:$8 sps:$4 sm:$0xff]   ;;  %v1600_v25 = vld [vmem:[#allocation5 + $0x70] ss:$8 sps:$4 sm:$0xff]   ;;  %v1610_v28 = vld [vmem:[#allocation7 + $0x20] sm:$0xff]   ;;  %p1812_p3 = scmp.ne.s32.totalorder %s2234_s20, %s1811_s23  ;;  %s1897_s13 = smov [#allocation11]  }
  0xa7   : > { %v1608_v23 = vld [vmem:[#allocation7 + $0x18] sm:$0xff]   ;;  %v412_v26 = vld [vmem:[%s2176_s9] sm:$0xff]  ;;  %v414_v31 = vld [vmem:[%s2176_s9 + $0x10] sm:$0xff]  ;;  %s1815_s24 = sshll.u32 %s1897_s13, 4  ;;  %s1816_s24 = int_to_ptr.vmem [resolvable:$false] %s1815_s24 }
  0xa8   : > { %534 = vmatpush1.bf16.msra.mxu0 %v1585_v6  ;;  %1416 = vmatpush3.bf16.msra.mxu1 %v1604_v15  ;;  %v413_v27 = vld [vmem:[%s2176_s9 + $0x8] sm:$0xff]  ;;  %v415_v32 = vld [vmem:[%s2176_s9 + $0x18] sm:$0xff]  ;;  %v416_v34 = vld [vmem:[%s2176_s9 + $0x20] sm:$0xff]  ;;  %p1813_p5 = pnand %p1812_p3, %p2115_p10  ;;  %s1817_s30 = scalar_lea.vmem %s1816_s24, 1536 }
  0xa9   : > { %535 = vmatprep.subr.bf16.mxu0 %v1586_v7  ;;  %1417 = vmatprep.subr.bf16.mxu1 %v1605_v16  ;;  %v418_v30 = vpack.c.bf16 %v413_v27, %v412_v26  ;;  %v419_v33 = vpack.c.bf16 %v415_v32, %v414_v31  ;;  %v417_v35 = vld [vmem:[%s2176_s9 + $0x28] sm:$0xff]  ;;  %v1613_v38 = vld [vmem:[#allocation7 + $0x70] sm:$0xff]   ;;  %v437_v55 = vld [vmem:[%s2280_s2] sm:$0x3]  ;;  %s2315_s9 = sld [smem:[#allocation18_spill]]  ;;  %p1818_p12 = scmp.lt.s32.totalorder %s2234_s20, %s1816_s24 }
  0xaa   : > { %v420_v36 = vpack.c.bf16 %v417_v35, %v416_v34  ;;  %v1612_v37 = vld [vmem:[#allocation7 + $0x28] sm:$0xff]   ;;  %v1614_v39 = vld [vmem:[#allocation7 + $0x30] sm:$0xff]   ;;  %v1615_v40 = vld [vmem:[#allocation7 + $0x78] sm:$0xff]   ;;  %v442_v57 = vrot.slane %v437_v55, %v441_v54  ;;  %v446_v58 = vrot.slane %v437_v55, %v445_v56  ;;  %p1814_p7 = pneg %p1813_p5  ;;  %p1819_p1 = scmp.lt.s32.totalorder %s1817_s30, %s1811_s23 }
  0xab   : > { %v1616_v41 = vld [vmem:[#allocation7 + $0x38] sm:$0xff]   ;;  %v1617_v42 = vld [vmem:[#allocation8] ss:$8 sps:$4 sm:$0xff]   ;;  %v1619_v43 = vld [vmem:[#allocation8 + $0x4] ss:$8 sps:$4 sm:$0xff]  }
  0xac   : > { %536 = vmatpush1.bf16.msra.mxu0 %v1588_v8  ;;  %1418 = vmatpush3.bf16.msra.mxu1 %v1606_v19  ;;  %v1622_v44 = vld [vmem:[#allocation8 + $0x14] ss:$8 sps:$4 sm:$0xff]   ;;  %v1620_v45 = vld [vmem:[#allocation8 + $0x10] ss:$8 sps:$4 sm:$0xff]   ;;  %v1625_v46 = vld [vmem:[#allocation8 + $0x24] ss:$8 sps:$4 sm:$0xff]   ;;  %p1820_p2 = por %p1819_p1, %p1818_p12 }
  0xad   : > { %537 = vmatprep.subr.bf16.mxu0 %v1589_v9  ;;  %1419 = vmatprep.subr.bf16.mxu1 %v1607_v21  ;;  %v1623_v47 = vld [vmem:[#allocation8 + $0x20] ss:$8 sps:$4 sm:$0xff]   ;;  %v1628_v48 = vld [vmem:[#allocation8 + $0x34] ss:$8 sps:$4 sm:$0xff]   ;;  %v1626_v49 = vld [vmem:[#allocation8 + $0x30] ss:$8 sps:$4 sm:$0xff]  }
  0xae   : > { %v1631_v50 = vld [vmem:[#allocation8 + $0x44] ss:$8 sps:$4 sm:$0xff]   ;;  %v1629_v51 = vld [vmem:[#allocation8 + $0x40] ss:$8 sps:$4 sm:$0xff]   ;;  %p1821_p13 = pnand %p1820_p2, %p1814_p7 }
  0xaf   : > { %v1649_v52 = vld [vmem:[#allocation10 + $0x60] sm:$0xff]   ;;  %s2232_s15 = scalar_lea.hbm %s2315_s9, %s1412_s16 }
  0xb0   : > { %538 = vmatpush1.bf16.msra.mxu0 %v1591_v10  ;;  %1420 = vmatpush3.bf16.msra.mxu1 %v1608_v23  ;;  %v1650_v55 = vld [vmem:[#allocation10 + $0x20] sm:$0xff]  }
  0xb1   : > { %539 = vmatprep.subr.bf16.mxu0 %v1592_v12  ;;  %1421 = vmatprep.subr.bf16.mxu1 %v1609_v24 }
  0xb4   : > { %540 = vmatpush1.bf16.msra.mxu0 %v1594_v17  ;;  %1422 = vmatpush3.bf16.msra.mxu1 %v1610_v28 }
  0xb5   : > { %541 = vmatprep.subr.bf16.mxu0 %v1595_v18  ;;  %1423 = vmatprep.subr.bf16.mxu1 %v1611_v29 }
  0xb8   : > { %542 = vmatpush1.bf16.msra.mxu0 %v1597_v20  ;;  %1424 = vmatpush3.bf16.msra.mxu1 %v1612_v37 }
  0xb9   : > { %543 = vmatprep.subr.bf16.mxu0 %v1598_v22  ;;  %1425 = vmatprep.subr.bf16.mxu1 %v1613_v38  ;;  %v1634_v38 = vld [vmem:[#allocation8 + $0x54] ss:$8 sps:$4 sm:$0xff]  }
  0xbc   : > { %544 = vmatpush1.bf16.msra.mxu0 %v1600_v25  ;;  %1426 = vmatpush3.bf16.msra.mxu1 %v1614_v39  ;;  %v1632_v39 = vld [vmem:[#allocation8 + $0x50] ss:$8 sps:$4 sm:$0xff]  }
  0xbd   : > { %1427 = vmatprep.subr.bf16.mxu1 %v1615_v40  ;;  %919 = vmatprep.subr.bf16.mxu0 %v1619_v43  ;;  %v1637_v40 = vld [vmem:[#allocation8 + $0x64] ss:$8 sps:$4 sm:$0xff]   ;;  %v1638_v43 = vld [vmem:[#allocation8 + $0x70] ss:$8 sps:$4 sm:$0xff]  }
  0xbf   : > { %562 = vmatmul.mubr.bf16.vlgmr.msra.gmra.mrb[0].mxu0 %v418_v30 }
  0xc0   : > { %571 = vmatprep.mubr.bf16.mxu0 %v1896_v0  ;;  %1428 = vmatpush3.bf16.msra.mxu1 %v1616_v41  ;;  %v1635_v41 = vld [vmem:[#allocation8 + $0x60] ss:$8 sps:$4 sm:$0xff]  }
  0xc1   : > { %920 = vmatpush1.bf16.msra.mxu0 %v1617_v42  ;;  %v1640_v42 = vld [vmem:[#allocation8 + $0x74] ss:$8 sps:$4 sm:$0xff]  }
  0xc2   : > { %921 = vmatprep.subr.bf16.mxu0 %v1622_v44  ;;  %v1641_v44 = vld [vmem:[#allocation10 + $0x40] sm:$0xff]  }
  0xc3   : > { %1447 = vmatprep.subr.bf16.mxu1 %v1641_v44 }
  0xc5   : > { %922 = vmatpush1.bf16.msra.mxu0 %v1620_v45  ;;  %v1642_v45 = vld [vmem:[#allocation10] sm:$0xff]  }
  0xc6   : > { %923 = vmatprep.subr.bf16.mxu0 %v1625_v46  ;;  %v1643_v46 = vld [vmem:[#allocation10 + $0x48] sm:$0xff]  }
  0xc7   : > { %572 = vmatmul.mubr.bf16.gmra.mrb[4].mxu0 %v419_v33 }
  0xc8   : > { %581 = vmatprep.mubr.bf16.mxu0 %v1896_v0 }
  0xc9   : > { %924 = vmatpush1.bf16.msra.mxu0 %v1623_v47  ;;  %v1644_v47 = vld [vmem:[#allocation10 + $0x8] sm:$0xff]  }
  0xca   : > { %925 = vmatprep.subr.bf16.mxu0 %v1628_v48  ;;  %v1645_v48 = vld [vmem:[#allocation10 + $0x50] sm:$0xff]  }
  0xcd   : > { %926 = vmatpush1.bf16.msra.mxu0 %v1626_v49  ;;  %v1646_v49 = vld [vmem:[#allocation10 + $0x10] sm:$0xff]  }
  0xce   : > { %927 = vmatprep.subr.bf16.mxu0 %v1631_v50  ;;  %v1647_v50 = vld [vmem:[#allocation10 + $0x58] sm:$0xff]  }
  0xcf   : > { %582 = vmatmul.mubr.bf16.gmra.mrb[8].mxu0 %v420_v36 }
  0xd0   : > { %951 = vmatprep.mubr.bf16.mxu0 %v1896_v0 }
  0xd1   : > { %928 = vmatpush1.bf16.msra.mxu0 %v1629_v51  ;;  %v1648_v51 = vld [vmem:[#allocation10 + $0x18] sm:$0xff]  }
  0xd2   : > { %929 = vmatprep.subr.bf16.mxu0 %v1634_v38 }
  0xd5   : > { %930 = vmatpush1.bf16.msra.mxu0 %v1632_v39 }
  0xd6   : > { %931 = vmatprep.subr.bf16.mxu0 %v1637_v40 }
  0xd9   : > { %932 = vmatpush1.bf16.msra.mxu0 %v1635_v41 }
  0xda   : > { %933 = vmatprep.subr.bf16.mxu0 %v1640_v42 }
  0xdd   : > { %934 = vmatpush1.bf16.msra.mxu0 %v1638_v43 }
 0x192   : > { %v563_v59 = vpop.f32.mrb[0].mxu0 }
 0x193   : > { %v564_v60 = vadd.f32 %v563_v59, %v442_v57  ;;  %v565_v61 = vpop.f32.mrb[1].mxu0  ;;  %v1358_v59 = vld [vmem:[%s2282_s4] ss:$0 sm:$0xff] }
 0x194   : > { %v566_v62 = vadd.f32 %v565_v61, %v446_v58  ;;  %v567_v63 = vpop.f32.mrb[2].mxu0 }
 0x195   : > { %v568_v1 = vadd.f32 %v567_v63, %v442_v57  ;;  %v569_v2 = vpop.f32.mrb[3].mxu0  ;;  %v592_v4 = vmax.f32 %v564_v60, 0.0 }
 0x196   : > { %v570_v3 = vadd.f32 %v569_v2, %v446_v58  ;;  %v593_v6 = vmax.f32 %v566_v62, 0.0 }
 0x197   : > { %v594_v5 = vmax.f32 %v568_v1, 0.0 }
 0x198   : > { %v595_v7 = vmax.f32 %v570_v3, 0.0 }
 0x199   : > { %v604_v8 = vpack.c.bf16 %v594_v5, %v592_v4 }
 0x19a   : > { %v573_v9 = vpop.f32.mrb[4].mxu0  ;;  %v605_v10 = vpack.c.bf16 %v595_v7, %v593_v6 }
 0x19b   : > { %v574_v11 = vadd.f32 %v573_v9, %v442_v57  ;;  %v575_v12 = vpop.f32.mrb[5].mxu0 }
 0x19c   : > { %v576_v13 = vadd.f32 %v575_v12, %v446_v58  ;;  %v577_v14 = vpop.f32.mrb[6].mxu0  ;;  %777 = vmatprep.mubr.bf16.mxu1 %v605_v10 }
 0x19d   : > { %v578_v15 = vadd.f32 %v577_v14, %v442_v57  ;;  %v579_v16 = vpop.f32.mrb[7].mxu0  ;;  %778 = vmatmul.mubr.bf16.vlgmr.msra.gmra.mrb[0].mxu1 %v604_v8  ;;  %v596_v18 = vmax.f32 %v574_v11, 0.0 }
 0x19e   : > { %v580_v17 = vadd.f32 %v579_v16, %v446_v58  ;;  %v597_v20 = vmax.f32 %v576_v13, 0.0  ;;  %1448 = vmatpush3.bf16.msra.mxu1 %v1642_v45 }
 0x19f   : > { %v598_v19 = vmax.f32 %v578_v15, 0.0  ;;  %1449 = vmatprep.subr.bf16.mxu1 %v1643_v46 }
 0x1a0   : > { %v599_v21 = vmax.f32 %v580_v17, 0.0 }
 0x1a1   : > { %v606_v22 = vpack.c.bf16 %v598_v19, %v596_v18 }
 0x1a2   : > { %v607_v23 = vpack.c.bf16 %v599_v21, %v597_v20  ;;  %v583_v24 = vpop.f32.mrb[8].mxu0  ;;  %1450 = vmatpush3.bf16.msra.mxu1 %v1644_v47 }
 0x1a3   : > { %v584_v25 = vadd.f32 %v583_v24, %v442_v57  ;;  %v585_v26 = vpop.f32.mrb[9].mxu0  ;;  %1451 = vmatprep.subr.bf16.mxu1 %v1645_v48 }
 0x1a4   : > { %v586_v27 = vadd.f32 %v585_v26, %v446_v58  ;;  %v587_v28 = vpop.f32.mrb[10].mxu0  ;;  %785 = vmatprep.mubr.bf16.mxu1 %v607_v23 }
 0x1a5   : > { %v588_v29 = vadd.f32 %v587_v28, %v442_v57  ;;  %v589_v30 = vpop.f32.mrb[11].mxu0  ;;  %786 = vmatmul.mubr.bf16.gmra.mrb[4].mxu1 %v606_v22  ;;  %v600_v32 = vmax.f32 %v584_v25, 0.0  ;;  %v1651_v57 = vld [vmem:[#allocation10 + $0x68] sm:$0xff]  }
 0x1a6   : > { %v590_v31 = vadd.f32 %v589_v30, %v446_v58  ;;  %v601_v34 = vmax.f32 %v586_v27, 0.0  ;;  %1452 = vmatpush3.bf16.msra.mxu1 %v1646_v49  ;;  %v1653_v30 = vld [vmem:[#allocation10 + $0x70] sm:$0xff]  }
 0x1a7   : > { %v602_v33 = vmax.f32 %v588_v29, 0.0  ;;  %1453 = vmatprep.subr.bf16.mxu1 %v1647_v50  ;;  %v1652_v29 = vld [vmem:[#allocation10 + $0x28] sm:$0xff]  }
 0x1a8   : > { %v603_v35 = vmax.f32 %v590_v31, 0.0  ;;  %v1654_v31 = vld [vmem:[#allocation10 + $0x30] sm:$0xff]  }
 0x1a9   : > { %v608_v36 = vpack.c.bf16 %v602_v33, %v600_v32  ;;  %v1655_v32 = vld [vmem:[#allocation10 + $0x78] sm:$0xff]  }
 0x1aa   : > { %v609_v37 = vpack.c.bf16 %v603_v35, %v601_v34  ;;  %1454 = vmatpush3.bf16.msra.mxu1 %v1648_v51  ;;  %v1656_v33 = vld [vmem:[#allocation10 + $0x38] sm:$0xff]   ;;  %v827_v34 = vld [vmem:[%s2284_s6] sm:$0x3] }
 0x1ab   : > { %1455 = vmatprep.subr.bf16.mxu1 %v1649_v52  ;;  %v836_v35 = vrot.slane %v827_v34, %v445_v56 }
 0x1ac   : > { %793 = vmatprep.mubr.bf16.mxu1 %v609_v37 }
 0x1ad   : > { %794 = vmatmul.mubr.bf16.gmra.mrb[8].mxu1 %v608_v36 }
 0x1ae   : > { %1456 = vmatpush3.bf16.msra.mxu1 %v1650_v55 }
 0x1af   : > { %1457 = vmatprep.subr.bf16.mxu1 %v1651_v57 }
 0x1b2   : > { %1458 = vmatpush3.bf16.msra.mxu1 %v1652_v29 }
 0x1b3   : > { %1459 = vmatprep.subr.bf16.mxu1 %v1653_v30 }
 0x1b6   : > { %1460 = vmatpush3.bf16.msra.mxu1 %v1654_v31 }
 0x1b7   : > { %1461 = vmatprep.subr.bf16.mxu1 %v1655_v32 }
 0x1ba   : > { %1462 = vmatpush3.bf16.msra.mxu1 %v1656_v33 }
 0x270   : > { %v1429_v58 = vpop.f32.mrb[0].mxu1 }
 0x271   : > { %v1430_v60 = vpop.f32.mrb[1].mxu1 }
 0x272   : > { %v1431_v61 = vadd.f32 %v1430_v60, %v1429_v58  ;;  %v1432_v62 = vpop.f32.mrb[2].mxu1 }
 0x273   : > { %v1433_v63 = vpop.f32.mrb[3].mxu1 }
 0x274   : > { %v780_v1 = vadd.f32 %v1431_v61, %v1358_v59  ;;  %v1434_v2 = vadd.f32 %v1433_v63, %v1432_v62 }
 0x276   : > { %v783_v3 = vadd.f32 %v1434_v2, %v1358_v59  ;;  %v802_v4 = vmax.f32 %v780_v1, 0.0 }
 0x278   : > { %v803_v5 = vmax.f32 %v783_v3, 0.0  ;;  %v1435_v6 = vpop.f32.mrb[4].mxu1 }
 0x279   : > { %v1436_v7 = vpop.f32.mrb[5].mxu1 }
 0x27a   : > { %v808_v8 = vpack.c.bf16 %v803_v5, %v802_v4  ;;  %v1437_v9 = vadd.f32 %v1436_v7, %v1435_v6  ;;  %v1438_v10 = vpop.f32.mrb[6].mxu1 }
 0x27b   : > { %v1439_v11 = vpop.f32.mrb[7].mxu1 }
 0x27c   : > { %v788_v12 = vadd.f32 %v1437_v9, %v1358_v59  ;;  %v1440_v13 = vadd.f32 %v1439_v11, %v1438_v10  ;;  %952 = vmatmul.mubr.bf16.vlgmr.msra.gmra.mrb[12].mxu0 %v808_v8 }
 0x27d   : > { %961 = vmatprep.mubr.bf16.mxu0 %v1896_v0 }
 0x27e   : > { %v791_v14 = vadd.f32 %v1440_v13, %v1358_v59  ;;  %v804_v15 = vmax.f32 %v788_v12, 0.0 }
 0x280   : > { %v805_v16 = vmax.f32 %v791_v14, 0.0  ;;  %v1441_v17 = vpop.f32.mrb[8].mxu1 }
 0x281   : > { %v1442_v18 = vpop.f32.mrb[9].mxu1 }
 0x282   : > { %v1443_v19 = vadd.f32 %v1442_v18, %v1441_v17  ;;  %v1444_v20 = vpop.f32.mrb[10].mxu1  ;;  %v809_v21 = vpack.c.bf16 %v805_v16, %v804_v15  ;;  %v1391_v16 = vld [vmem:[%s2286_s8] ss:$0 sm:$0xff] }
 0x283   : > { %v1445_v22 = vpop.f32.mrb[11].mxu1 }
 0x284   : > { %v796_v23 = vadd.f32 %v1443_v19, %v1358_v59  ;;  %v1446_v24 = vadd.f32 %v1445_v22, %v1444_v20  ;;  %962 = vmatmul.mubr.bf16.gmra.mrb[16].mxu0 %v809_v21 }
 0x285   : > { %971 = vmatprep.mubr.bf16.mxu0 %v1896_v0  ;;  %v832_v0 = vrot.slane %v827_v34, %v441_v54 }
 0x286   : > { %v799_v25 = vadd.f32 %v1446_v24, %v1358_v59  ;;  %v806_v26 = vmax.f32 %v796_v23, 0.0 }
 0x288   : > { %v807_v27 = vmax.f32 %v799_v25, 0.0 }
 0x28a   : > { %v810_v28 = vpack.c.bf16 %v807_v27, %v806_v26 }
 0x28c   : > { %972 = vmatmul.mubr.bf16.gmra.mrb[20].mxu0 %v810_v28 }
 0x34f   : > { %v953_v36 = vpop.f32.mrb[12].mxu0 }
 0x350   : > { %v954_v37 = vadd.f32 %v953_v36, %v832_v0  ;;  %v955_v38 = vpop.f32.mrb[13].mxu0 }
 0x351   : > { %v956_v39 = vadd.f32 %v955_v38, %v836_v35  ;;  %v957_v40 = vpop.f32.mrb[14].mxu0 }
 0x352   : > { %v958_v41 = vadd.f32 %v957_v40, %v832_v0  ;;  %v959_v42 = vpop.f32.mrb[15].mxu0  ;;  %v982_v44 = vmax.f32 %v954_v37, 0.0 }
 0x353   : > { %v960_v43 = vadd.f32 %v959_v42, %v836_v35  ;;  %v983_v46 = vmax.f32 %v956_v39, 0.0 }
 0x354   : > { %v984_v45 = vmax.f32 %v958_v41, 0.0 }
 0x355   : > { %v985_v47 = vmax.f32 %v960_v43, 0.0 }
 0x356   : > { %v994_v48 = vpack.c.bf16 %v984_v45, %v982_v44 }
 0x357   : > { %v995_v49 = vpack.c.bf16 %v985_v47, %v983_v46  ;;  %v963_v50 = vpop.f32.mrb[16].mxu0 }
 0x358   : > { %v964_v51 = vadd.f32 %v963_v50, %v832_v0  ;;  %v965_v54 = vpop.f32.mrb[17].mxu0 }
 0x359   : > { %v966_v52 = vadd.f32 %v965_v54, %v836_v35  ;;  %v967_v53 = vpop.f32.mrb[18].mxu0  ;;  %1167 = vmatprep.mubr.bf16.mxu1 %v995_v49 }
 0x35a   : > { %v968_v56 = vadd.f32 %v967_v53, %v832_v0  ;;  %v969_v55 = vpop.f32.mrb[19].mxu0  ;;  %1168 = vmatmul.mubr.bf16.vlgmr.msra.gmra.mrb[12].mxu1 %v994_v48  ;;  %v986_v58 = vmax.f32 %v964_v51, 0.0 }
 0x35b   : > { %v970_v57 = vadd.f32 %v969_v55, %v836_v35  ;;  %v987_v60 = vmax.f32 %v966_v52, 0.0 }
 0x35c   : > { %v988_v59 = vmax.f32 %v968_v56, 0.0 }
 0x35d   : > { %v989_v61 = vmax.f32 %v970_v57, 0.0 }
 0x35e   : > { %v996_v62 = vpack.c.bf16 %v988_v59, %v986_v58 }
 0x35f   : > { %v997_v63 = vpack.c.bf16 %v989_v61, %v987_v60  ;;  %v973_v1 = vpop.f32.mrb[20].mxu0 }
 0x360   : > { %v974_v2 = vadd.f32 %v973_v1, %v832_v0  ;;  %v975_v3 = vpop.f32.mrb[21].mxu0 }
 0x361   : > { %v976_v4 = vadd.f32 %v975_v3, %v836_v35  ;;  %v977_v5 = vpop.f32.mrb[22].mxu0  ;;  %1175 = vmatprep.mubr.bf16.mxu1 %v997_v63 }
 0x362   : > { %v978_v6 = vadd.f32 %v977_v5, %v832_v0  ;;  %v979_v7 = vpop.f32.mrb[23].mxu0  ;;  %1176 = vmatmul.mubr.bf16.gmra.mrb[16].mxu1 %v996_v62  ;;  %v990_v9 = vmax.f32 %v974_v2, 0.0 }
 0x363   : > { %v980_v8 = vadd.f32 %v979_v7, %v836_v35  ;;  %v991_v11 = vmax.f32 %v976_v4, 0.0 }
 0x364   : > { %v992_v10 = vmax.f32 %v978_v6, 0.0 }
 0x365   : > { %v993_v12 = vmax.f32 %v980_v8, 0.0 }
 0x366   : > { %v998_v13 = vpack.c.bf16 %v992_v10, %v990_v9 }
 0x367   : > { %v999_v14 = vpack.c.bf16 %v993_v12, %v991_v11 }
 0x369   : > { %1183 = vmatprep.mubr.bf16.mxu1 %v999_v14 }
 0x36a   : > { %1184 = vmatmul.mubr.bf16.gmra.mrb[20].mxu1 %v998_v13 }
 0x42d   : > { %v1463_v15 = vpop.f32.mrb[12].mxu1 }
 0x42e   : > { %v1464_v17 = vpop.f32.mrb[13].mxu1 }
 0x42f   : > { %v1465_v18 = vadd.f32 %v1464_v17, %v1463_v15  ;;  %v1466_v19 = vpop.f32.mrb[14].mxu1 }
 0x430   : > { %v1467_v20 = vpop.f32.mrb[15].mxu1 }
 0x431   : > { %v1170_v21 = vadd.f32 %v1465_v18, %v1391_v16  ;;  %v1468_v22 = vadd.f32 %v1467_v20, %v1466_v19 }
 0x433   : > { %1657 = vtanh.f32 %v1170_v21  ;;  %v1173_v23 = vadd.f32 %v1468_v22, %v1391_v16 }
 0x435   : > { %1659 = vtanh.f32 %v1173_v23  ;;  %v1469_v24 = vpop.f32.mrb[16].mxu1 }
 0x436   : > { %v1470_v25 = vpop.f32.mrb[17].mxu1 }
 0x437   : > { %v1471_v26 = vadd.f32 %v1470_v25, %v1469_v24  ;;  %v1472_v27 = vpop.f32.mrb[18].mxu1 }
 0x438   : > { %v1473_v28 = vpop.f32.mrb[19].mxu1 }
 0x439   : > { %v1178_v29 = vadd.f32 %v1471_v26, %v1391_v16  ;;  %v1474_v30 = vadd.f32 %v1473_v28, %v1472_v27 }
 0x43b   : > { %1661 = vtanh.f32 %v1178_v29  ;;  %v1181_v31 = vadd.f32 %v1474_v30, %v1391_v16 }
 0x43d   : > { %v1658_v32 = vpop.eup %1657  ;;  %1663 = vtanh.f32 %v1181_v31  ;;  %v1475_v33 = vpop.f32.mrb[20].mxu1 }
 0x43e   : > { %1198 = vst [vmem:[%s408_s25] sm:$0xff] %v1658_v32  ;;  %v1476_v34 = vpop.f32.mrb[21].mxu1 }
 0x43f   : > { %v1660_v0 = vpop.eup %1659  ;;  %v1477_v35 = vadd.f32 %v1476_v34, %v1475_v33  ;;  %v1478_v36 = vpop.f32.mrb[22].mxu1 }
 0x440   : > { %1199 = vst [vmem:[%s408_s25 + $0x8] sm:$0xff] %v1660_v0  ;;  %v1479_v37 = vpop.f32.mrb[23].mxu1 }
 0x441   : > { %v1186_v38 = vadd.f32 %v1477_v35, %v1391_v16  ;;  %v1480_v39 = vadd.f32 %v1479_v37, %v1478_v36 }
 0x443   : > { %1665 = vtanh.f32 %v1186_v38  ;;  %v1189_v40 = vadd.f32 %v1480_v39, %v1391_v16 }
 0x445   : > { %v1662_v41 = vpop.eup %1661  ;;  %1667 = vtanh.f32 %v1189_v40 }
 0x446   : > { %1200 = vst [vmem:[%s408_s25 + $0x10] sm:$0xff] %v1662_v41 }
 0x447   : > { %v1664_v42 = vpop.eup %1663 }
 0x448   : > { %1201 = vst [vmem:[%s408_s25 + $0x18] sm:$0xff] %v1664_v42 }
 0x44d   : > { %v1666_v43 = vpop.eup %1665 }
 0x44e   : > { %1202 = vst [vmem:[%s408_s25 + $0x20] sm:$0xff] %v1666_v43 }
 0x44f   : > { %v1668_v44 = vpop.eup %1667 }
 0x450   : > { %1203 = vst [vmem:[%s408_s25 + $0x28] sm:$0xff] %v1668_v44 }
 0x451   : > { %1824 = shalt.err (!%p1821_p13)
}
 0x452   : > { %s1825_s29 = scalar_lea.hbm %s2232_s15, 768  ;;  %s1829_s25 = scalar_lea.hbm %s2315_s9, 1536 }
 0x453   : > { %p1826_p9 = scmp.ne.s32.totalorder %s2232_s15, %s1825_s29  ;;  %p1830_p4 = scmp.lt.u32.totalorder %s2232_s15, %s2315_s9 }
 0x454   : > { %p1831_p8 = scmp.lt.u32.totalorder %s1829_s25, %s1825_s29  ;;  %p1833_p3 = scmp.lt.u32.totalorder %s1825_s29, %s2232_s15 }
 0x455   : > { %p1827_p0 = pnand %p1826_p9, %p2115_p10 }
 0x456   : > { %p1832_p6 = por %p1831_p8, %p1830_p4 }
 0x457   : > { %p1828_p11 = pneg %p1827_p0 }
 0x458   : > { %p1834_p5 = por %p1833_p3, %p1832_p6 }
 0x45a   : > { %p1835_p7 = pnand %p1834_p5, %p1828_p11 }
 0x45c   : > { %1838 = shalt.err (!%p1835_p7)
}
 0x45d   : > { %s1898_s21 = smov 128   ;;  %s1899_s23 = smov 8  }
 0x45e   : > { %1501 = dma.vmem_to_hbm [thread:$0]  (%p2115_p10), %s2234_s20, 768, %s2232_s15, %s1205_s17, %s1898_s21, %s1898_s21, %s1899_s23  }
 0x45f PF: > { %s2316_s13 = sld [smem:[#allocation16_spill]]  ;;  %s2317_s24 = sld [smem:[#allocation17_spill]] }
 0x460   : > { %p2319_p1 = scmp.ge.s32.totalorder %s1885_s12, 2 }
 0x465   : > { %s1233_s30 = sand.u32 1, %s2316_s13   ;;  %p2318_p12 = scmp.ne.s32.totalorder %s2317_s24, 0 }
 0x466   : > { %s1234_s29 = scalar_lea.sflag [#allocation4], %s1233_s30 }
 0x467   : > { %p1521_p2 = pnand %p2319_p1, %p2318_p12 }
 0x469   : > { %1868 = dma.done.wait (!%p1521_p2), %s1234_s29, 768  }
 0x46a   : > { %1870 = vsyncadd (!%p1521_p2), %s1234_s29, 4294966528  ;;  %p24_p13 = scmp.ge.s32.totalorder %s2105_s14, 4   ;;  %s2320_s30 = smov %s1877_s10 }
 0x46b   : > { %s2321_s10 = smov %s1881_s11  ;;  %s2322_s11 = smov %s2121_s27 }
 0x46c   : > { %s2323_s12 = smov %s2105_s14  ;;  %26 = sbr.rel (!%p24_p13) target bundleno = 9 (0x9), region = 117 }
 0x473   :  { %1239 = vsyncpa [#allocation3], 1 }
 0x474   :  { %1241 = vsyncpa [#allocation3 + $0x1], 1 }
 0x475   :  { %1242 = vsyncpa [#allocation6], 1 }
 0x476   :  { %1243 = vsyncpa [#allocation9], 1 }
 0x477   :  { %1244 = vsyncpa [#allocation4], 1 }
 0x478   :  { %1246 = vsyncpa [#allocation4 + $0x1], 1 }

</bundles_post_ra>
